<compile_context>
chip_gen: v5e
topology: v5e:2x2
jax: 0.10.0
libtpu: 0.0.40
codegen_flags: <defaults>
</compile_context>

<pallas_src>
import functools

import jax
import jax.numpy as jnp
import numpy as np
from jax.experimental import pallas as pl
from jax.experimental.pallas import tpu as pltpu


def _round_up(x, m):
    return ((x + m - 1) // m) * m


def _vmem_bytes(tb, d, np_, l, cp):
    # double-buffered x-in / out blocks (f32) + f32 scratch + grid-invariant operands (bf16/f32)
    in_out = 2 * (tb * d * np_ * 4 + tb * l * cp * 4)
    scratch = tb * (l + 4) * np_ * 4
    invariant = 2 * (np_ * np_ * 2 + 3 * np_ * cp * 2 + cp * 4)
    return in_out + scratch + invariant


def _pick_batch_tile(b, d, np_, l, cp):
    """Pick a batch tile giving >=2 grid steps (pipelining + v7x megacore), targeting ~8
    steps, under a VMEM budget sized so 2x the estimate fits v7x's 64 MiB."""
    if b == 1:
        return 1
    budget = 24 << 20
    best, best_score = 1, None
    for t in range(1, b + 1):
        if b % t or b // t < 2 or _vmem_bytes(t, d, np_, l, cp) > budget:
            continue
        steps = b // t
        score = (abs(steps - 8), steps)  # prefer ~8 steps; tie-break to bigger tiles
        if best_score is None or score < best_score:
            best, best_score = t, score
    return best


def _mixprop_kernel(x_ref, aT_ref, w_ref, b_ref, out_ref, pad_ref, *, gdep, alpha):
    # x_ref:   (TB, D, Np)    f32 batch tile (node dim zero-padded to Np, a 128 multiple)
    # aT_ref:  (Np, Np)       bf16 pre-normalized (adj+I)/rowsum, pre-transposed: aT[w,v]=a[v,w]
    # w_ref:   (3, Np, Cp)    bf16 conv taps (tap-major), node rows / c_out lanes zero-padded
    # b_ref:   (1, Cp)        f32 bias (zero-padded)
    # out_ref: (TB, L, Cp)    f32 lane-dense output block
    # pad_ref: (TB, L+4, Np)  f32 VMEM scratch: circularly padded concat of hops
    TB, D, Np = x_ref.shape
    L, Cp = out_ref.shape[1], out_ref.shape[2]

    x3 = x_ref[...]                        # (TB, D, Np) f32
    x2 = x3.reshape(TB * D, Np)            # batch folded into the matmul M dimension
    aT = aT_ref[...]                       # (Np, Np) bf16

    # --- mix-hop propagation; each hop written at its static offset in the padded scratch ---
    pad_ref[:, 2:2 + D, :] = x3            # hop 0 at padded rows [2, 2+D)
    h = x2
    for i in range(1, gdep + 1):
        prop = jnp.dot(h.astype(jnp.bfloat16), aT,
                       preferred_element_type=jnp.float32)          # bf16 MXU, f32 accumulate
        h = alpha * x2 + (1.0 - alpha) * prop                       # f32 VPU mix
        pad_ref[:, 2 + i * D:2 + (i + 1) * D, :] = h.reshape(TB, D, Np)

    # --- circular padding rows (Conv1d padding=2, padding_mode='circular'); read back from the
    #     scratch so no full hop tensor stays live across the unrolled loop ---
    pad_ref[:, 0:2, :] = pad_ref[:, L:L + 2, :]        # ho[L-2:L]
    pad_ref[:, L + 2:L + 4, :] = pad_ref[:, 2:4, :]    # ho[0:2]

    # --- dilated conv: taps at static offsets 0, 2, 4; accumulate directly into out_ref ---
    # y[b,t,c] = bias[c] + sum_k sum_n W[k,n,c] * ho[b, (t + 2k - 2) mod L, n]
    tap0 = pad_ref[:, 0:L, :].reshape(TB * L, Np).astype(jnp.bfloat16)
    out_ref[...] = (jnp.dot(tap0, w_ref[0], preferred_element_type=jnp.float32)
                    + b_ref[...]).reshape(TB, L, Cp)                 # bias folded into init
    for k in range(1, 3):
        tap = pad_ref[:, 2 * k:2 * k + L, :].reshape(TB * L, Np).astype(jnp.bfloat16)
        out_ref[...] += jnp.dot(tap, w_ref[k],
                                preferred_element_type=jnp.float32).reshape(TB, L, Cp)


def mixprop_forward(x, adj, conv_w, conv_b, *, gdep, alpha, batch_tile=None):
    """Pallas mixprop forward.

    x: (B, D, N), adj: (N, N),
    conv_w: (c_out, c_in=N, K=3)  -- PyTorch Conv1d weight layout,
    conv_b: (c_out,).
    Returns (B, (gdep+1)*D, c_out), matching mixprop.forward.
    """
    x = x.astype(jnp.float32)
    adj = adj.astype(jnp.float32)
    conv_w = conv_w.astype(jnp.float32)
    conv_b = conv_b.astype(jnp.float32)

    B, D, N = x.shape
    c_out, c_in, K = conv_w.shape
    assert K == 3 and c_in == N
    L = (gdep + 1) * D
    assert L >= 2  # circular padding=2 needs at least 2 rows (mirrors the PyTorch constraint)
    # Perf note: keep L=(gdep+1)*D a multiple of 8 so hop writes / (TB*L, .) reshapes stay
    # sublane-aligned; N and c_out are lane-padded below so they carry no constraint.

    Np = _round_up(N, 128)
    Cp = _round_up(c_out, 128)
    # Perf note (v5e): with c_out << 128 the padded writeback is 8x larger; emitting the output
    # at true c_out (masked store) can win there. Lane-dense default favors v6e/v7x.

    # Batch-invariant adjacency normalization hoisted out of the kernel, pre-transposed so the
    # in-kernel propagation is a plain h @ a_T on the MXU; zero-padded to (Np, Np), bf16 operand.
    adj_n = adj + jnp.eye(N, dtype=jnp.float32)   # assumes nonnegative adj (rowsums stay > 0)
    a_t = jnp.transpose(adj_n / jnp.sum(adj_n, axis=1, keepdims=True))
    a_t = jnp.pad(a_t, ((0, Np - N), (0, Np - N))).astype(jnp.bfloat16)

    # Conv1d weight (c_out, N, K) re-laid tap-major (K, N, c_out), zero-padded, bf16 operand.
    w_t = jnp.transpose(conv_w, (2, 1, 0))
    w_p = jnp.pad(w_t, ((0, 0), (0, Np - N), (0, Cp - c_out))).astype(jnp.bfloat16)
    b_p = jnp.pad(conv_b, (0, Cp - c_out)).reshape(1, Cp)

    x_p = jnp.pad(x, ((0, 0), (0, 0), (0, Np - N)))   # lane-dense input blocks

    TB = _pick_batch_tile(B, D, Np, L, Cp) if batch_tile is None else batch_tile
    assert B % TB == 0, "batch_tile must divide batch"
    vmem_limit = int(min(64 << 20, max(2 * _vmem_bytes(TB, D, Np, L, Cp), 32 << 20)))

    kernel = functools.partial(_mixprop_kernel, gdep=gdep, alpha=alpha)

    out_p = pl.pallas_call(
        kernel,
        out_shape=jax.ShapeDtypeStruct((B, L, Cp), jnp.float32),
        grid_spec=pltpu.PrefetchScalarGridSpec(
            num_scalar_prefetch=0,
            grid=(B // TB,),
            in_specs=[
                pl.BlockSpec((TB, D, Np), lambda b: (b, 0, 0)),
                pl.BlockSpec((Np, Np), lambda b: (0, 0)),
                pl.BlockSpec((3, Np, Cp), lambda b: (0, 0, 0)),
                pl.BlockSpec((1, Cp), lambda b: (0, 0)),
            ],
            out_specs=pl.BlockSpec((TB, L, Cp), lambda b: (b, 0, 0)),
            scratch_shapes=[pltpu.VMEM((TB, L + 4, Np), jnp.float32)],
        ),
        compiler_params=pltpu.CompilerParams(
            dimension_semantics=("parallel",),
            vmem_limit_bytes=vmem_limit,
        ),
    )(x_p, a_t, w_p, b_p)

    return out_p[:, :, :c_out] if Cp != c_out else out_p


def mixprop_reference(x, adj, conv_w, conv_b, *, gdep, alpha):
    """Pure-JAX reference mirroring the PyTorch semantics (conv_w in Conv1d layout)."""
    x = x.astype(jnp.float32)
    adj = adj.astype(jnp.float32)
    N = adj.shape[0]
    adj_n = adj + jnp.eye(N, dtype=jnp.float32)
    a = adj_n / jnp.sum(adj_n, axis=1, keepdims=True)

    hp = jax.lax.Precision.HIGHEST
    h = x
    outs = [h]
    for _ in range(gdep):
        h = alpha * x + (1.0 - alpha) * jnp.einsum('bdw,vw->bdv', h, a, precision=hp)
        outs.append(h)
    ho = jnp.concatenate(outs, axis=1)          # (B, L, N)
    B, L, _ = ho.shape

    c_out = conv_w.shape[0]
    y = jnp.zeros((B, L, c_out), jnp.float32)
    for k in range(3):
        idx = (jnp.arange(L) + 2 * k - 2) % L   # circular padding=2, dilation=2
        y = y + jnp.einsum('bln,cn->blc', ho[:, idx, :], conv_w[:, :, k], precision=hp)
    return y + conv_b[None, None, :]


if __name__ == "__main__":
    # Small shapes consistent with mixprop: c_in (= num nodes N) = 8, c_out = 16, gdep = 2.
    B, D, N, C_OUT, GDEP, ALPHA = 4, 8, 8, 16, 2, 0.05
    # TODO(synk): dropout is stored on the module but never applied in forward(); nothing to do.

    key = jax.random.PRNGKey(0)
    k1, k2, k3, k4 = jax.random.split(key, 4)
    x = jax.random.normal(k1, (B, D, N), dtype=jnp.float32)
    adj = jax.random.uniform(k2, (N, N), dtype=jnp.float32)
    # Conv1d parameters in PyTorch layout: weight (c_out, c_in=N, K=3), bias (c_out,)
    conv_w = 0.1 * jax.random.normal(k3, (C_OUT, N, 3), dtype=jnp.float32)
    conv_b = 0.1 * jax.random.normal(k4, (C_OUT,), dtype=jnp.float32)

    out = mixprop_forward(x, adj, conv_w, conv_b, gdep=GDEP, alpha=ALPHA)
    out = jax.block_until_ready(out)

    ref = mixprop_reference(x, adj, conv_w, conv_b, gdep=GDEP, alpha=ALPHA)
    # Kernel uses bf16 MXU operands with f32 accumulation -> compare at bf16-level tolerance.
    np.testing.assert_allclose(np.asarray(out), np.asarray(ref), rtol=2e-2, atol=2e-2)

    print("KERNEL_OK")
</pallas_src>

<mosaic_0001>
module attributes {stable_mosaic.version = 11 : i64} {
  func.func @_mixprop_kernel(%arg0: i32, %arg1: memref<1x8x128xf32, #tpu.memory_space<vmem>>, %arg2: memref<128x128xbf16, #tpu.memory_space<vmem>>, %arg3: memref<3x128x128xbf16, #tpu.memory_space<vmem>>, %arg4: memref<1x128xf32, #tpu.memory_space<vmem>>, %arg5: memref<1x24x128xf32, #tpu.memory_space<vmem>>, %arg6: memref<1x28x128xf32, #tpu.memory_space<vmem>>) attributes {dimension_semantics = [#tpu.dimension_semantics<parallel>], iteration_bounds = array<i64: 4>, scalar_prefetch = 0 : i64, scratch_operands = 1 : i64, tpu.core_type = #tpu.core_type<tc>, window_params = [{transform_indices = @transform_0, window_bounds = array<i64: 1, 8, 128>}, {pipeline_mode = #tpu.pipeline_mode<synchronous>, transform_indices = @transform_1, window_bounds = array<i64: 128, 128>}, {pipeline_mode = #tpu.pipeline_mode<synchronous>, transform_indices = @transform_2, window_bounds = array<i64: 3, 128, 128>}, {pipeline_mode = #tpu.pipeline_mode<synchronous>, transform_indices = @transform_3, window_bounds = array<i64: 1, 128>}, {transform_indices = @transform_4, window_bounds = array<i64: 1, 24, 128>}]} {
    %c0 = arith.constant 0 : index
    %c0_0 = arith.constant 0 : index
    %c0_1 = arith.constant 0 : index
    %0 = vector.load %arg1[%c0, %c0_0, %c0_1] : memref<1x8x128xf32, #tpu.memory_space<vmem>>, vector<1x8x128xf32>
    %1 = vector.shape_cast %0 : vector<1x8x128xf32> to vector<8x128xf32>
    %c0_2 = arith.constant 0 : index
    %c0_3 = arith.constant 0 : index
    %2 = vector.load %arg2[%c0_2, %c0_3] : memref<128x128xbf16, #tpu.memory_space<vmem>>, vector<128x128xbf16>
    %c0_4 = arith.constant 0 : index
    %c2 = arith.constant 2 : index
    %c0_5 = arith.constant 0 : index
    %3 = vector.load %arg6[%c0_4, %c2, %c0_5] : memref<1x28x128xf32, #tpu.memory_space<vmem>>, vector<1x8x128xf32>
    tpu.vector_store %arg6[%c0_4, %c2, %c0_5], %0 {strides = array<i32>} : memref<1x28x128xf32, #tpu.memory_space<vmem>>, vector<1x8x128xf32>,
    %4 = arith.truncf %1 : vector<8x128xf32> to vector<8x128xbf16>
    %cst = arith.constant dense<0.000000e+00> : vector<8x128xf32>
    %5 = tpu.matmul %4, %2, %cst {dimension_numbers = #tpu.dot_dimension_numbers<[1], [0], [0], [1], [0, 0, 1, 1], [], []>} : vector<8x128xbf16>, vector<128x128xbf16>, vector<8x128xf32> -> vector<8x128xf32>
    %cst_6 = arith.constant 5.000000e-02 : f32
    %6 = vector.broadcast %cst_6 : f32 to vector<8x128xf32>
    %7 = arith.mulf %6, %1 : vector<8x128xf32>
    %cst_7 = arith.constant 0.949999988 : f32
    %8 = vector.broadcast %cst_7 : f32 to vector<8x128xf32>
    %9 = arith.mulf %8, %5 : vector<8x128xf32>
    %10 = arith.addf %7, %9 : vector<8x128xf32>
    %11 = vector.shape_cast %10 : vector<8x128xf32> to vector<1x8x128xf32>
    %c0_8 = arith.constant 0 : index
    %c10 = arith.constant 10 : index
    %c0_9 = arith.constant 0 : index
    %12 = vector.load %arg6[%c0_8, %c10, %c0_9] : memref<1x28x128xf32, #tpu.memory_space<vmem>>, vector<1x8x128xf32>
    tpu.vector_store %arg6[%c0_8, %c10, %c0_9], %11 {strides = array<i32>} : memref<1x28x128xf32, #tpu.memory_space<vmem>>, vector<1x8x128xf32>,
    %13 = arith.truncf %10 : vector<8x128xf32> to vector<8x128xbf16>
    %cst_10 = arith.constant dense<0.000000e+00> : vector<8x128xf32>
    %14 = tpu.matmul %13, %2, %cst_10 {dimension_numbers = #tpu.dot_dimension_numbers<[1], [0], [0], [1], [0, 0, 1, 1], [], []>} : vector<8x128xbf16>, vector<128x128xbf16>, vector<8x128xf32> -> vector<8x128xf32>
    %cst_11 = arith.constant 5.000000e-02 : f32
    %15 = vector.broadcast %cst_11 : f32 to vector<8x128xf32>
    %16 = arith.mulf %15, %1 : vector<8x128xf32>
    %cst_12 = arith.constant 0.949999988 : f32
    %17 = vector.broadcast %cst_12 : f32 to vector<8x128xf32>
    %18 = arith.mulf %17, %14 : vector<8x128xf32>
    %19 = arith.addf %16, %18 : vector<8x128xf32>
    %20 = vector.shape_cast %19 : vector<8x128xf32> to vector<1x8x128xf32>
    %c0_13 = arith.constant 0 : index
    %c18 = arith.constant 18 : index
    %c0_14 = arith.constant 0 : index
    %21 = vector.load %arg6[%c0_13, %c18, %c0_14] : memref<1x28x128xf32, #tpu.memory_space<vmem>>, vector<1x8x128xf32>
    tpu.vector_store %arg6[%c0_13, %c18, %c0_14], %20 {strides = array<i32>} : memref<1x28x128xf32, #tpu.memory_space<vmem>>, vector<1x8x128xf32>,
    %c0_15 = arith.constant 0 : index
    %c24 = arith.constant 24 : index
    %c0_16 = arith.constant 0 : index
    %22 = vector.load %arg6[%c0_15, %c24, %c0_16] : memref<1x28x128xf32, #tpu.memory_space<vmem>>, vector<1x2x128xf32>
    %c0_17 = arith.constant 0 : index
    %c0_18 = arith.constant 0 : index
    %c0_19 = arith.constant 0 : index
    %23 = vector.load %arg6[%c0_17, %c0_18, %c0_19] : memref<1x28x128xf32, #tpu.memory_space<vmem>>, vector<1x2x128xf32>
    tpu.vector_store %arg6[%c0_17, %c0_18, %c0_19], %22 {strides = array<i32>} : memref<1x28x128xf32, #tpu.memory_space<vmem>>, vector<1x2x128xf32>,
    %c0_20 = arith.constant 0 : index
    %c2_21 = arith.constant 2 : index
    %c0_22 = arith.constant 0 : index
    %24 = vector.load %arg6[%c0_20, %c2_21, %c0_22] : memref<1x28x128xf32, #tpu.memory_space<vmem>>, vector<1x2x128xf32>
    %c0_23 = arith.constant 0 : index
    %c26 = arith.constant 26 : index
    %c0_24 = arith.constant 0 : index
    %25 = vector.load %arg6[%c0_23, %c26, %c0_24] : memref<1x28x128xf32, #tpu.memory_space<vmem>>, vector<1x2x128xf32>
    tpu.vector_store %arg6[%c0_23, %c26, %c0_24], %24 {strides = array<i32>} : memref<1x28x128xf32, #tpu.memory_space<vmem>>, vector<1x2x128xf32>,
    %c0_25 = arith.constant 0 : index
    %c0_26 = arith.constant 0 : index
    %c0_27 = arith.constant 0 : index
    %26 = vector.load %arg6[%c0_25, %c0_26, %c0_27] : memref<1x28x128xf32, #tpu.memory_space<vmem>>, vector<1x24x128xf32>
    %27 = vector.shape_cast %26 : vector<1x24x128xf32> to vector<24x128xf32>
    %28 = arith.truncf %27 : vector<24x128xf32> to vector<24x128xbf16>
    %c0_28 = arith.constant 0 : index
    %c0_29 = arith.constant 0 : index
    %c0_30 = arith.constant 0 : index
    %29 = vector.load %arg3[%c0_28, %c0_29, %c0_30] : memref<3x128x128xbf16, #tpu.memory_space<vmem>>, vector<1x128x128xbf16>
    %30 = vector.shape_cast %29 : vector<1x128x128xbf16> to vector<128x128xbf16>
    %cst_31 = arith.constant dense<0.000000e+00> : vector<24x128xf32>
    %31 = tpu.matmul %28, %30, %cst_31 {dimension_numbers = #tpu.dot_dimension_numbers<[1], [0], [0], [1], [0, 0, 1, 1], [], []>} : vector<24x128xbf16>, vector<128x128xbf16>, vector<24x128xf32> -> vector<24x128xf32>
    %c0_32 = arith.constant 0 : index
    %c0_33 = arith.constant 0 : index
    %32 = vector.load %arg4[%c0_32, %c0_33] : memref<1x128xf32, #tpu.memory_space<vmem>>, vector<1x128xf32>
    %33 = vector.broadcast %32 : vector<1x128xf32> to vector<24x128xf32>
    %34 = arith.addf %31, %33 : vector<24x128xf32>
    %35 = vector.shape_cast %34 : vector<24x128xf32> to vector<1x24x128xf32>
    %c0_34 = arith.constant 0 : index
    %c0_35 = arith.constant 0 : index
    %c0_36 = arith.constant 0 : index
    %36 = vector.load %arg5[%c0_34, %c0_35, %c0_36] : memref<1x24x128xf32, #tpu.memory_space<vmem>>, vector<1x24x128xf32>
    tpu.vector_store %arg5[%c0_34, %c0_35, %c0_36], %35 {strides = array<i32>} : memref<1x24x128xf32, #tpu.memory_space<vmem>>, vector<1x24x128xf32>,
    %c0_37 = arith.constant 0 : index
    %c2_38 = arith.constant 2 : index
    %c0_39 = arith.constant 0 : index
    %37 = vector.load %arg6[%c0_37, %c2_38, %c0_39] : memref<1x28x128xf32, #tpu.memory_space<vmem>>, vector<1x24x128xf32>
    %38 = vector.shape_cast %37 : vector<1x24x128xf32> to vector<24x128xf32>
    %39 = arith.truncf %38 : vector<24x128xf32> to vector<24x128xbf16>
    %c0_40 = arith.constant 0 : index
    %c0_41 = arith.constant 0 : index
    %c0_42 = arith.constant 0 : index
    %40 = vector.load %arg5[%c0_40, %c0_41, %c0_42] : memref<1x24x128xf32, #tpu.memory_space<vmem>>, vector<1x24x128xf32>
    %c1 = arith.constant 1 : index
    %c0_43 = arith.constant 0 : index
    %c0_44 = arith.constant 0 : index
    %41 = vector.load %arg3[%c1, %c0_43, %c0_44] : memref<3x128x128xbf16, #tpu.memory_space<vmem>>, vector<1x128x128xbf16>
    %42 = vector.shape_cast %41 : vector<1x128x128xbf16> to vector<128x128xbf16>
    %cst_45 = arith.constant dense<0.000000e+00> : vector<24x128xf32>
    %43 = tpu.matmul %39, %42, %cst_45 {dimension_numbers = #tpu.dot_dimension_numbers<[1], [0], [0], [1], [0, 0, 1, 1], [], []>} : vector<24x128xbf16>, vector<128x128xbf16>, vector<24x128xf32> -> vector<24x128xf32>
    %44 = vector.shape_cast %43 : vector<24x128xf32> to vector<1x24x128xf32>
    %45 = arith.addf %40, %44 : vector<1x24x128xf32>
    %c0_46 = arith.constant 0 : index
    %c0_47 = arith.constant 0 : index
    %c0_48 = arith.constant 0 : index
    %46 = vector.load %arg5[%c0_46, %c0_47, %c0_48] : memref<1x24x128xf32, #tpu.memory_space<vmem>>, vector<1x24x128xf32>
    tpu.vector_store %arg5[%c0_46, %c0_47, %c0_48], %45 {strides = array<i32>} : memref<1x24x128xf32, #tpu.memory_space<vmem>>, vector<1x24x128xf32>,
    %c0_49 = arith.constant 0 : index
    %c4 = arith.constant 4 : index
    %c0_50 = arith.constant 0 : index
    %47 = vector.load %arg6[%c0_49, %c4, %c0_50] : memref<1x28x128xf32, #tpu.memory_space<vmem>>, vector<1x24x128xf32>
    %48 = vector.shape_cast %47 : vector<1x24x128xf32> to vector<24x128xf32>
    %49 = arith.truncf %48 : vector<24x128xf32> to vector<24x128xbf16>
    %c0_51 = arith.constant 0 : index
    %c0_52 = arith.constant 0 : index
    %c0_53 = arith.constant 0 : index
    %50 = vector.load %arg5[%c0_51, %c0_52, %c0_53] : memref<1x24x128xf32, #tpu.memory_space<vmem>>, vector<1x24x128xf32>
    %c2_54 = arith.constant 2 : index
    %c0_55 = arith.constant 0 : index
    %c0_56 = arith.constant 0 : index
    %51 = vector.load %arg3[%c2_54, %c0_55, %c0_56] : memref<3x128x128xbf16, #tpu.memory_space<vmem>>, vector<1x128x128xbf16>
    %52 = vector.shape_cast %51 : vector<1x128x128xbf16> to vector<128x128xbf16>
    %cst_57 = arith.constant dense<0.000000e+00> : vector<24x128xf32>
    %53 = tpu.matmul %49, %52, %cst_57 {dimension_numbers = #tpu.dot_dimension_numbers<[1], [0], [0], [1], [0, 0, 1, 1], [], []>} : vector<24x128xbf16>, vector<128x128xbf16>, vector<24x128xf32> -> vector<24x128xf32>
    %54 = vector.shape_cast %53 : vector<24x128xf32> to vector<1x24x128xf32>
    %55 = arith.addf %50, %54 : vector<1x24x128xf32>
    %c0_58 = arith.constant 0 : index
    %c0_59 = arith.constant 0 : index
    %c0_60 = arith.constant 0 : index
    %56 = vector.load %arg5[%c0_58, %c0_59, %c0_60] : memref<1x24x128xf32, #tpu.memory_space<vmem>>, vector<1x24x128xf32>
    tpu.vector_store %arg5[%c0_58, %c0_59, %c0_60], %55 {strides = array<i32>} : memref<1x24x128xf32, #tpu.memory_space<vmem>>, vector<1x24x128xf32>,
    return
  }
  func.func @transform_0(%arg0: i32) -> (i32, i32, i32) {
    %c0_i32 = arith.constant 0 : i32
    %c0_i32_0 = arith.constant 0 : i32
    %c0_i32_1 = arith.constant 0 : i32
    return %arg0, %c0_i32, %c0_i32_0 : i32, i32, i32
  }
  func.func @transform_1(%arg0: i32) -> (i32, i32) {
    %c0_i32 = arith.constant 0 : i32
    %c0_i32_0 = arith.constant 0 : i32
    %c0_i32_1 = arith.constant 0 : i32
    return %c0_i32, %c0_i32_0 : i32, i32
  }
  func.func @transform_2(%arg0: i32) -> (i32, i32, i32) {
    %c0_i32 = arith.constant 0 : i32
    %c0_i32_0 = arith.constant 0 : i32
    %c0_i32_1 = arith.constant 0 : i32
    %c0_i32_2 = arith.constant 0 : i32
    return %c0_i32, %c0_i32_0, %c0_i32_1 : i32, i32, i32
  }
  func.func @transform_3(%arg0: i32) -> (i32, i32) {
    %c0_i32 = arith.constant 0 : i32
    %c0_i32_0 = arith.constant 0 : i32
    %c0_i32_1 = arith.constant 0 : i32
    return %c0_i32, %c0_i32_0 : i32, i32
  }
  func.func @transform_4(%arg0: i32) -> (i32, i32, i32) {
    %c0_i32 = arith.constant 0 : i32
    %c0_i32_0 = arith.constant 0 : i32
    %c0_i32_1 = arith.constant 0 : i32
    return %arg0, %c0_i32, %c0_i32_0 : i32, i32, i32
  }
}

</mosaic_0001>

<bundles_post_ra>
// kernel: tpu_custom_call.1
= control target key start
LH: loop header
LB: loop body
LE: loop exit
PB: predicated region body
PF: predicated region fallthrough
CT: control target
= control target key end

     0   :  { %9 = vsyncpa [#allocation4], 0  ;;  %s1337_s0 = inlined_call_operand.hbm [shape: f32[4,8,128], index: 0, kind: input, shape index: {}]   ;;  %s1338_s1 = inlined_call_operand.hbm [shape: bf16[128,128], index: 1, kind: input, shape index: {}]   ;;  %s1339_s2 = inlined_call_operand.hbm [shape: bf16[3,128,128], index: 2, kind: input, shape index: {}]   ;;  %s1340_s3 = inlined_call_operand.vmem [shape: f32[1,128], index: 3, kind: input, shape index: {}]   ;;  %s1341_s4 = inlined_call_operand.hbm [shape: f32[4,24,128], index: 4, kind: output, shape index: {}]  }
   0x1   :  { %11 = vsyncpa [#allocation4 + $0x1], 0 }
   0x2   :  { %12 = vsyncpa [#allocation7], 0 }
   0x3   :  { %13 = vsyncpa [#allocation5], 0 }
   0x4   :  { %15 = vsyncpa [#allocation5 + $0x1], 0  ;;  %s1190_s15 = smov 0   ;;  %s1192_s16 = smov 0  }
   0x5   :  { %s1194_s17 = smov 0   ;;  %s1196_s18 = smov 0  }
   0x6 LB: > { %s152_s21 = sshll.u32 %s1338_s1, 4  ;;  %s1214_s22 = sadd.s32 4294967295, %s1157_s18   ;;  %s1157_s18 = sphi %s1196_s18, %s1351_s18   ;;  %s1153_s17 = sphi %s1194_s17, %s1350_s17   ;;  %s1149_s16 = sphi %s1192_s16, %s1349_s16   ;;  %s1145_s15 = sphi %s1190_s15, %s1348_s15   ;;  %s153_s21 = int_to_ptr.hbm [resolvable:$true] %s152_s21 }
   0x7   : > { %p750_p0 = scmp.ge.s32.totalorder %s1157_s18, 1  ;;  %p42_p1 = scmp.eq.s32.totalorder %s1214_s22, 0 }
   0x8   : > { %p141_p2 = scmp.lt.s32.totalorder %s1157_s18, 5  ;;  %s1159_s24 = smov [#allocation6]  }
   0x9   : > { %s154_s25 = sshll.u32 %s1159_s24, 4  ;;  %s166_s28 = sshll.u32 %s1339_s2, 4  ;;  %s155_s25 = int_to_ptr.vmem [resolvable:$true] %s154_s25  ;;  %s167_s28 = int_to_ptr.hbm [resolvable:$true] %s166_s28 }
   0xa   : > { %p1219_p3 = pnand %p750_p0, %p141_p2  ;;  %s1160_s29 = smov [#allocation8]  }
   0xb   : > { %s168_s30 = sshll.u32 %s1160_s29, 4  ;;  %s1161_s5 = smov 64   ;;  %s169_s30 = int_to_ptr.vmem [resolvable:$true] %s168_s30 }
   0xc   : > { %p937_p4 = pneg %p1219_p3  ;;  %s1162_s6 = smov 4  }
   0xd   : > { %s749_s7 = sadd.s32 4294967294, %s1157_s18   ;;  %s1232_s8 = sadd.s32 1, %s1157_s18  }
   0xe   : > { %p938_p5 = pnand %p937_p4, %p42_p1  ;;  %s25_s9 = ssub.s32 %s1157_s18, %s1232_s8 }
   0xf   : > { %s28_s10 = sadd.s32 1, %s1153_s17  ;;  %p26_p6 = scmp.eq.s32.totalorder %s25_s9, 0 }
  0x10   : > { %940 = dma.hbm_to_vmem [thread:$0]  (!%p938_p5), %s153_s21, 1024, %s155_s25, [#allocation7], %s1161_s5, %s1161_s5, %s1162_s6  }
  0x11   : > { %943 = dma.hbm_to_vmem [thread:$0]  (!%p938_p5), %s167_s28, 3072, %s169_s30, [#allocation7], %s1161_s5, %s1161_s5, %s1162_s6  }
  0x12   : > { %p35_p7 = scmp.ne.s32.totalorder %s1153_s17, %s1149_s16  ;;  %p36_p8 = scmp.eq.s32.totalorder %s1157_s18, 0 }
  0x13   : > { %p41_p9 = scmp.ne.s32.totalorder %s1149_s16, %s1145_s15  ;;  %p128_p12 = scmp.eq.s32.totalorder %s1214_s22, 3 }
  0x14   : > { %s1243_s11 = scalar_select %p26_p6, %s1153_s17, %s28_s10  }
  0x15   : > { %p1245_p10 = por %p36_p8, %p35_p7  ;;  %p1251_p11 = por %p42_p1, %p41_p9 }
  0x16   : > { %p134_p13 = scmp.eq.s32.totalorder %s749_s7, 3  ;;  %p954_p0 = scmp.lt.s32.totalorder %s1157_s18, 4 }
  0x17   : > { %s185_s14 = sand.u32 1, %s1153_s17   ;;  %p1258_p2 = por %p128_p12, %p35_p7 }
  0x18   : > { %p1262_p4 = por %p134_p13, %p41_p9  ;;  %s754_s21 = sshll.u32 %s185_s14, 3 }
  0x19   : > { %s755_s24 = sshll.u32 %s1157_s18, 3  ;;  %s189_s28 = scalar_lea.vmem [#allocation3], %s754_s21 }
  0x1a   : > { %s193_s27 = scalar_lea.hbm %s1337_s0, %s755_s24  ;;  %s197_s29 = sshll.u32 %s189_s28, 4  ;;  %s198_s29 = int_to_ptr.vmem [resolvable:$true] %s197_s29 }
  0x1b   : > { %s195_s30 = sshll.u32 %s193_s27, 4  ;;  %p1272_p5 = pnand %p954_p0, %p1245_p10  ;;  %s196_s30 = int_to_ptr.hbm [resolvable:$true] %s195_s30 }
  0x1c   : > { %s186_s6 = scalar_lea.sflag [#allocation4], %s185_s14  ;;  %s1057_s7 = sshra.s32 %s196_s30, 4  ;;  %s1058_s7 = int_to_ptr.hbm [resolvable:$true] %s1057_s7 }
  0x1d   : > { %s1059_s9 = scalar_lea.hbm %s1058_s7, 8  ;;  %p1061_p7 = pneg %p1272_p5 }
  0x1e   : > { %p1060_p6 = scmp.ne.s32.totalorder %s1058_s7, %s1059_s9  ;;  %s1064_s24 = scalar_lea.hbm %s1337_s0, 32 }
  0x1f   : > { %p1065_p10 = scmp.lt.s32.totalorder %s1058_s7, %s1337_s0  ;;  %p1066_p12 = scmp.lt.s32.totalorder %s1064_s24, %s1059_s9 }
  0x20   : > { %p1062_p8 = pnand %p1061_p7, %p1060_p6 }
  0x21   : > { %p1067_p13 = por %p1066_p12, %p1065_p10 }
  0x22   : > { %p1063_p9 = pneg %p1062_p8 }
  0x24   : > { %p1068_p0 = pnand %p1067_p13, %p1063_p9 }
  0x26   : > { %1071 = shalt.err (!%p1068_p0)
}
  0x27   : > { %947 = dma.hbm_to_vmem [thread:$0]  (!%p1272_p5), %s196_s30, 128, %s198_s29, %s186_s6  }
  0x28   : > { %206 = sbr.rel (%p1219_p3) target bundleno = 519 (0x207), region = 36  ;;  %s1289_s14 = sand.u32 (!%p1219_p3), 1, %s1149_s16  }
  0x29   : > { %s757_s26 = sshll.u32 (!%p1219_p3), %s1289_s14, 3  ;;  %s209_s27 = scalar_lea.sflag (!%p1219_p3), [#allocation4], %s1289_s14 }
  0x2a   : > { %s212_s28 = scalar_lea.vmem (!%p1219_p3), [#allocation3], %s757_s26 }
  0x2d   : > { %1132 = dma.done.wait (%p1251_p11), %s209_s27, 128  }
  0x2e   : > { %1134 = vsyncadd (%p1251_p11), %s209_s27, 4294967168 }
  0x2f   : > { %1136 = dma.done.wait (%p42_p1), [#allocation7], 4096  }
  0x30   : > { %1138 = vsyncadd (%p42_p1), [#allocation7], 4294963200  ;;  %v898_v0 = vld [vmem:[#allocation6 + $0x38] sm:$0xff]  ;;  %v897_v1 = vld [vmem:[#allocation6 + $0x30] sm:$0xff]  ;;  %s923_s29 = smul.u32 24, %s1289_s14  ;;  %s642_s24 = scalar_lea.sflag [#allocation5], %s1289_s14 }
  0x31   : > { %315 = vmatpush.bf16.msra.mxu1 %v898_v0  ;;  %v248_v2 = vld [vmem:[%s212_s28] sm:$0xff]  ;;  %v896_v3 = vld [vmem:[#allocation6 + $0x28] sm:$0xff]  ;;  %v895_v5 = vld [vmem:[#allocation6 + $0x20] sm:$0xff]  ;;  %s924_s5 = smul.u32 24, %s1214_s22  ;;  %s1107_s27 = scalar_lea.hbm %s1341_s4, 96 }
  0x32   : > { %265 = vst [vmem:[#allocation2 + $0x2] sm:$0xff] %v248_v2  ;;  %v914_v4 = vld [vmem:[#allocation8 + $0x78] sm:$0xff]  ;;  %v913_v6 = vld [vmem:[#allocation8 + $0x70] sm:$0xff]  ;;  %v912_v8 = vld [vmem:[#allocation8 + $0x68] sm:$0xff]  ;;  %v266_v13 = vpack.c.bf16 %v248_v2, %v248_v2  ;;  %v328_v24 = vmul.f32 0.05, %v248_v2 }
  0x33   : > { %520 = vmatpush.bf16.msra.mxu3 %v914_v4  ;;  %v894_v7 = vld [vmem:[#allocation6 + $0x18] sm:$0xff]  ;;  %v893_v9 = vld [vmem:[#allocation6 + $0x10] sm:$0xff]  ;;  %v911_v10 = vld [vmem:[#allocation8 + $0x60] sm:$0xff]  ;;  %s247_s30 = scalar_lea.vmem [#allocation9], %s923_s29  ;;  %s653_s9 = scalar_lea.hbm %s1341_s4, %s924_s5 }
  0x34   : > { %v892_v11 = vld [vmem:[#allocation6 + $0x8] sm:$0xff]  ;;  %v891_v12 = vld [vmem:[#allocation6] sm:$0xff]  ;;  %v910_v14 = vld [vmem:[#allocation8 + $0x58] sm:$0xff]  ;;  %s654_s10 = sshll.u32 %s247_s30, 4  ;;  %s656_s21 = sshll.u32 %s653_s9, 4  ;;  %s655_s10 = int_to_ptr.vmem [resolvable:$true] %s654_s10  ;;  %s657_s21 = int_to_ptr.hbm [resolvable:$true] %s656_s21 }
  0x35   : > { %316 = vmatpush.bf16.msra.mxu1 %v897_v1  ;;  %v909_v15 = vld [vmem:[#allocation8 + $0x50] sm:$0xff]  ;;  %v908_v16 = vld [vmem:[#allocation8 + $0x48] sm:$0xff]  ;;  %v907_v17 = vld [vmem:[#allocation8 + $0x40] sm:$0xff]  ;;  %s1101_s22 = sshra.s32 %s657_s21, 4  ;;  %s1102_s22 = int_to_ptr.hbm [resolvable:$true] %s1101_s22 }
  0x36   : > { %v922_v18 = vld [vmem:[#allocation8 + $0xb8] sm:$0xff]  ;;  %v921_v20 = vld [vmem:[#allocation8 + $0xb0] sm:$0xff]  ;;  %v920_v22 = vld [vmem:[#allocation8 + $0xa8] sm:$0xff]  ;;  %s1103_s25 = scalar_lea.hbm %s1102_s22, 24  ;;  %p1108_p5 = scmp.lt.s32.totalorder %s1102_s22, %s1341_s4 }
  0x37   : > { %521 = vmatpush.bf16.msra.mxu3 %v913_v6  ;;  %v906_v19 = vld [vmem:[#allocation8 + $0x38] sm:$0xff]  ;;  %617 = vmatpush.bf16.msra.mxu0 %v922_v18  ;;  %v905_v21 = vld [vmem:[#allocation8 + $0x30] sm:$0xff]  ;;  %v919_v23 = vld [vmem:[#allocation8 + $0xa0] sm:$0xff]  ;;  %p1104_p1 = scmp.ne.s32.totalorder %s1102_s22, %s1103_s25  ;;  %p1109_p6 = scmp.lt.s32.totalorder %s1107_s27, %s1103_s25 }
  0x38   : > { %426 = vmatpush.bf16.msra.mxu2 %v906_v19  ;;  %v904_v31 = vld [vmem:[#allocation8 + $0x28] sm:$0xff]  ;;  %v918_v32 = vld [vmem:[#allocation8 + $0x98] sm:$0xff]  ;;  %v903_v33 = vld [vmem:[#allocation8 + $0x20] sm:$0xff] }
  0x39   : > { %317 = vmatpush.bf16.msra.mxu1 %v896_v3  ;;  %v917_v34 = vld [vmem:[#allocation8 + $0x90] sm:$0xff]  ;;  %v902_v36 = vld [vmem:[#allocation8 + $0x18] sm:$0xff]  ;;  %v916_v37 = vld [vmem:[#allocation8 + $0x88] sm:$0xff]  ;;  %p1105_p3 = pnand %p1104_p1, %p1258_p2  ;;  %p1110_p7 = por %p1109_p6, %p1108_p5 }
  0x3a   : > { %v351_v35 = vld [vmem:[#allocation2 + $0x2] sm:$0x3]  ;;  %v915_v39 = vld [vmem:[#allocation8 + $0x80] sm:$0xff]  ;;  %v900_v40 = vld [vmem:[#allocation8 + $0x8] sm:$0xff] }
  0x3b   : > { %522 = vmatpush.bf16.msra.mxu3 %v912_v8  ;;  %618 = vmatpush.bf16.msra.mxu0 %v921_v20  ;;  %352 = vst [vmem:[#allocation2 + $0x1a] sm:$0x3] %v351_v35  ;;  %v901_v38 = vld [vmem:[#allocation8 + $0x10] sm:$0xff]  ;;  %v899_v41 = vld [vmem:[#allocation8] sm:$0xff]  ;;  %p1106_p11 = pneg %p1105_p3 }
  0x3c   : > { %427 = vmatpush.bf16.msra.mxu2 %v905_v21 }
  0x3d   : > { %318 = vmatpush.bf16.msra.mxu1 %v895_v5  ;;  %p1111_p8 = pnand %p1110_p7, %p1106_p11 }
  0x3f   : > { %523 = vmatpush.bf16.msra.mxu3 %v911_v10  ;;  %619 = vmatpush.bf16.msra.mxu0 %v920_v22 }
  0x40   : > { %428 = vmatpush.bf16.msra.mxu2 %v904_v31 }
  0x41   : > { %319 = vmatpush.bf16.msra.mxu1 %v894_v7 }
  0x43   : > { %524 = vmatpush.bf16.msra.mxu3 %v910_v14  ;;  %620 = vmatpush.bf16.msra.mxu0 %v919_v23 }
  0x44   : > { %429 = vmatpush.bf16.msra.mxu2 %v903_v33 }
  0x45   : > { %320 = vmatpush.bf16.msra.mxu1 %v893_v9 }
  0x47   : > { %525 = vmatpush.bf16.msra.mxu3 %v909_v15  ;;  %621 = vmatpush.bf16.msra.mxu0 %v918_v32 }
  0x48   : > { %430 = vmatpush.bf16.msra.mxu2 %v902_v36 }
  0x49   : > { %321 = vmatpush.bf16.msra.mxu1 %v892_v11 }
  0x4b   : > { %526 = vmatpush.bf16.msra.mxu3 %v908_v16  ;;  %622 = vmatpush.bf16.msra.mxu0 %v917_v34 }
  0x4c   : > { %431 = vmatpush.bf16.msra.mxu2 %v901_v38 }
  0x4d   : > { %322 = vmatpush.bf16.msra.mxu1 %v891_v12 }
  0x4f   : > { %527 = vmatpush.bf16.msra.mxu3 %v907_v17  ;;  %623 = vmatpush.bf16.msra.mxu0 %v916_v37 }
  0x50   : > { %323 = vmatmul.bf16.vlgmr.msra.gmra.mxu1 %v266_v13  ;;  %432 = vmatpush.bf16.msra.mxu2 %v900_v40 }
  0x51   : > { %333 = vmatpush.bf16.msrb.mxu1 %v898_v0  ;;  %v996_v0 = vld [vmem:[%s1340_s3] ss:$0 sm:$0xff] }
  0x53   : > { %624 = vmatpush.bf16.msra.mxu0 %v915_v39 }
  0x54   : > { %433 = vmatpush.bf16.msra.mxu2 %v899_v41 }
  0x55   : > { %334 = vmatpush.bf16.msrb.mxu1 %v897_v1 }
  0x59   : > { %335 = vmatpush.bf16.msrb.mxu1 %v896_v3 }
  0x5d   : > { %336 = vmatpush.bf16.msrb.mxu1 %v895_v5 }
  0x61   : > { %337 = vmatpush.bf16.msrb.mxu1 %v894_v7 }
  0x65   : > { %338 = vmatpush.bf16.msrb.mxu1 %v893_v9 }
  0x69   : > { %339 = vmatpush.bf16.msrb.mxu1 %v892_v11 }
  0x6d   : > { %340 = vmatpush.bf16.msrb.mxu1 %v891_v12 }
  0xcd   : > { %v324_v25 = vpop.f32.mrf.mxu1 }
  0xce   : > { %v329_v26 = vmul.f32 0.95, %v324_v25 }
  0xd0   : > { %v330_v27 = vadd.f32 %v329_v26, %v328_v24 }
  0xd2   : > { %331 = vst [vmem:[#allocation2 + $0xa] sm:$0xff] %v330_v27  ;;  %v332_v28 = vpack.c.bf16 %v330_v27, %v330_v27  ;;  %v450_v29 = vpack.c.bf16 %v330_v27, %v248_v2 }
  0xd4   : > { %341 = vmatmul.bf16.vlgmr.msrb.gmra.mxu1 %v332_v28  ;;  %528 = vmatmul.bf16.vlgmr.msra.gmra.mxu3 %v450_v29 }
  0xd5   : > { %v326_v30 = vpop.f32.mrf.mxu1 }
  0xd9   : > { %v544_v47 = vld [vmem:[#allocation2 + $0x4] sm:$0xff] }
  0xda   : > { %v354_v52 = vld [vmem:[#allocation2 + $0x8] sm:$0xff] }
 0x151   : > { %v342_v42 = vpop.f32.mrf.mxu1 }
 0x152   : > { %v346_v43 = vmul.f32 0.95, %v342_v42 }
 0x154   : > { %v347_v44 = vadd.f32 %v346_v43, %v328_v24 }
 0x156   : > { %348 = vst [vmem:[#allocation2 + $0x12] sm:$0xff] %v347_v44  ;;  %v451_v45 = vpack.c.bf16 %v347_v44, %v347_v44 }
 0x157   : > { %v529_v58 = vpop.f32.mrf.mxu3 }
 0x158   : > { %533 = vmatmul.bf16.gmra.mxu3 %v451_v45 }
 0x159   : > { %v344_v46 = vpop.f32.mrf.mxu1 }
 0x15d   : > { %v545_v48 = vld [vmem:[#allocation2 + $0xc] sm:$0xff]  ;;  %v349_v49 = vld [vmem:[#allocation2 + $0x18] sm:$0x3] }
 0x15e   : > { %v547_v50 = vpack.c.bf16 %v545_v48, %v544_v47  ;;  %350 = vst [vmem:[#allocation2] sm:$0x3] %v349_v49  ;;  %v546_v54 = vld [vmem:[#allocation2 + $0x14] sm:$0xff] }
 0x15f   : > { %v548_v55 = vpack.c.bf16 %v546_v54, %v546_v54  ;;  %v355_v56 = vld [vmem:[#allocation2 + $0x10] sm:$0xff]  ;;  %v531_v59 = vpop.f32.mrf.mxu3 }
 0x160   : > { %625 = vmatmul.bf16.vlgmr.msra.gmra.mxu0 %v547_v50  ;;  %v357_v57 = vpack.c.bf16 %v355_v56, %v355_v56 }
 0x165   : > { %v353_v51 = vld [vmem:[#allocation2] sm:$0xff] }
 0x166   : > { %v356_v53 = vpack.c.bf16 %v354_v52, %v353_v51 }
 0x168   : > { %434 = vmatmul.bf16.vlgmr.msra.gmra.mxu2 %v356_v53 }
 0x170   : > { %630 = vmatmul.bf16.gmra.mxu0 %v548_v55 }
 0x178   : > { %439 = vmatmul.bf16.gmra.mxu2 %v357_v57 }
 0x1db   : > { %v534_v60 = vpop.f32.mrf.mxu3 }
 0x1dd   : > { %v626_v61 = vpop.f32.mrf.mxu0 }
 0x1e3   : > { %v536_v62 = vpop.f32.mrf.mxu3 }
 0x1e5   : > { %v628_v63 = vpop.f32.mrf.mxu0 }
 0x1eb   : > { %v435_v1 = vpop.f32.mrf.mxu2 }
 0x1ec   : > { %v436_v2 = vadd.f32 %v996_v0, %v435_v1 }
 0x1ed   : > { %v631_v3 = vpop.f32.mrf.mxu0 }
 0x1ee   : > { %v538_v4 = vadd.f32 %v529_v58, %v436_v2 }
 0x1f0   : > { %v635_v5 = vadd.f32 %v626_v61, %v538_v4 }
 0x1f2   : > { %638 = vst [vmem:[%s247_s30] sm:$0xff] %v635_v5 }
 0x1f3   : > { %v437_v6 = vpop.f32.mrf.mxu2 }
 0x1f4   : > { %v438_v7 = vadd.f32 %v996_v0, %v437_v6 }
 0x1f5   : > { %v633_v8 = vpop.f32.mrf.mxu0 }
 0x1f6   : > { %v539_v9 = vadd.f32 %v531_v59, %v438_v7 }
 0x1f8   : > { %v636_v10 = vadd.f32 %v628_v63, %v539_v9 }
 0x1fa   : > { %639 = vst [vmem:[%s247_s30 + $0x8] sm:$0xff] %v636_v10 }
 0x1fb   : > { %v440_v11 = vpop.f32.mrf.mxu2 }
 0x1fc   : > { %v441_v12 = vadd.f32 %v996_v0, %v440_v11 }
 0x1fe   : > { %v540_v13 = vadd.f32 %v534_v60, %v441_v12 }
 0x200   : > { %v637_v14 = vadd.f32 %v631_v3, %v540_v13 }
 0x202   : > { %640 = vst [vmem:[%s247_s30 + $0x10] sm:$0xff] %v637_v14 }
 0x203   : > { %v442_v15 = vpop.f32.mrf.mxu2 }
 0x204   : > { %1114 = shalt.err (!%p1111_p8)
}
 0x205   : > { %s1163_s14 = smov 128   ;;  %s1164_s13 = smov 8  }
 0x206   : > { %935 = dma.vmem_to_hbm [thread:$0]  (%p1258_p2), %s655_s10, 384, %s657_s21, %s642_s24, %s1163_s14, %s1163_s14, %s1164_s13  }
 0x207 PF: > { %p957_p9 = scmp.ge.s32.totalorder %s1157_s18, 2  ;;  %s671_s29 = sand.u32 1, %s1145_s15  }
 0x208   : > { %s672_s30 = scalar_lea.sflag [#allocation5], %s671_s29 }
 0x209   : > { %p949_p10 = pnand %p957_p9, %p1262_p4 }
 0x20b   : > { %p950_p12 = pneg %p949_p10 }
 0x20d   : > { %1140 = dma.done.wait (%p950_p12), %s672_s30, 384  }
 0x20e   : > { %1142 = vsyncadd (%p950_p12), %s672_s30, 4294966912  ;;  %p18_p13 = scmp.ge.s32.totalorder %s1232_s8, 6   ;;  %s1348_s15 = smov %s1149_s16 }
 0x20f   : > { %s1349_s16 = smov %s1153_s17  ;;  %s1350_s17 = smov %s1243_s11 }
 0x210   : > { %s1351_s18 = smov %s1232_s8  ;;  %20 = sbr.rel (!%p18_p13) target bundleno = 6 (0x6), region = 91 }
 0x215   :  { %678 = vsyncpa [#allocation4], 1 }
 0x216   :  { %680 = vsyncpa [#allocation4 + $0x1], 1 }
 0x217   :  { %681 = vsyncpa [#allocation7], 1 }
 0x218   :  { %682 = vsyncpa [#allocation5], 1 }
 0x219   :  { %684 = vsyncpa [#allocation5 + $0x1], 1 }

</bundles_post_ra>
